<compile_context>
chip_gen: v7x
topology: tpu7x:2x2x1
jax: 0.10.0
libtpu: 0.0.40
codegen_flags: <defaults>
</compile_context>

<pallas_src>
import functools

import jax
import jax.numpy as jnp
from jax.experimental import pallas as pl
from jax.experimental.pallas import tpu as pltpu

_VMEM_LIMIT = 32 * 1024 * 1024      # comfortably within every generation's budget (v7x: 64 MiB)
_MASK_BIAS = -9e15                  # only used by the pure-JAX reference (pyGAT semantics)

_CompilerParams = getattr(pltpu, "CompilerParams", None) or getattr(pltpu, "TPUCompilerParams")


def _round_up(n, m):
    return (n + m - 1) // m * m


def _bf16_eup_available():
    """bf16 EUP (fast bf16 exp) exists on TPU v6e / v7x; older chips keep f32 exp."""
    try:
        kind = jax.devices()[0].device_kind.lower()
    except Exception:
        return False
    return ("v6" in kind) or ("v7" in kind)


def _pick_block(n_pad, max_val, step, prefer_even_tiles=False):
    cands = [d for d in range(step, max_val + 1, step) if n_pad % d == 0]
    if not cands:
        return step
    if prefer_even_tiles:
        even = [d for d in cands if (n_pad // d) % 2 == 0]
        if even:
            return max(even)
    return max(cands)


def _choose_tiling(n, max_block_q, max_block_k):
    """(n_pad, block_q, block_k): blocks divide n_pad; block_q is 32-aligned (int8 mask
    sublanes); block_k is 128-aligned or the full dim; padding is 64/128-granular (no
    lcm blow-up); >= 2 query tiles whenever possible (v7x megacore)."""
    assert max_block_q % 32 == 0 and max_block_k % 128 == 0
    if n <= max_block_k:                          # whole key axis in one tile
        n_pad = _round_up(max(n, 64), 64)
        block_k = n_pad                           # == full dim -> always legal
        block_q = min(max_block_q, n_pad // 2)    # >= 2 query tiles for megacore
        while n_pad % block_q:
            block_q -= 32
        return n_pad, max(block_q, 32), block_k
    n_pad = _round_up(n, 128)                     # lane-granular padding
    block_k = _pick_block(n_pad, max_block_k, 128)
    block_q = _pick_block(n_pad, max_block_q, 32, prefer_even_tiles=True)
    return n_pad, block_q, block_k


def _maybe_buffered_spec(block_shape, index_map, buffers):
    """BlockSpec with deeper multi-buffering where this JAX exposes pl.Buffered."""
    if hasattr(pl, "Buffered"):
        try:
            return pl.BlockSpec(block_shape, index_map, pipeline_mode=pl.Buffered(buffers))
        except TypeError:  # older BlockSpec without pipeline_mode
            pass
    return pl.BlockSpec(block_shape, index_map)


# --------------------------- kernel A: fused projection ---------------------------
def _proj_kernel(x_ref, wh_ref, wa1_ref, wa2_ref, h_ref, f1_ref, f2_ref):
    x = x_ref[...]
    h_ref[...] = jnp.dot(x, wh_ref[...],
                         preferred_element_type=jnp.float32).astype(h_ref.dtype)
    f1_ref[...] = jnp.dot(x, wa1_ref[...], preferred_element_type=jnp.float32)
    f2_ref[...] = jnp.dot(x, wa2_ref[...], preferred_element_type=jnp.float32)


def _project(x_pad, w_h, wa1, wa2, *, block_q):
    n_pad, f_in = x_pad.shape
    d_h = w_h.shape[1]
    nheads = wa1.shape[1]
    return pl.pallas_call(
        _proj_kernel,
        out_shape=(jax.ShapeDtypeStruct((n_pad, d_h), jnp.bfloat16),     # h (MXU operand)
                   jax.ShapeDtypeStruct((n_pad, nheads), jnp.float32),   # f1
                   jax.ShapeDtypeStruct((n_pad, nheads), jnp.float32)),  # f2
        grid=(n_pad // block_q,),
        in_specs=[
            pl.BlockSpec((block_q, f_in), lambda i: (i, 0)),
            pl.BlockSpec((f_in, d_h), lambda i: (0, 0)),
            pl.BlockSpec((f_in, nheads), lambda i: (0, 0)),
            pl.BlockSpec((f_in, nheads), lambda i: (0, 0)),
        ],
        out_specs=(pl.BlockSpec((block_q, d_h), lambda i: (i, 0)),
                   pl.BlockSpec((block_q, nheads), lambda i: (i, 0)),
                   pl.BlockSpec((block_q, nheads), lambda i: (i, 0))),
        compiler_params=_CompilerParams(
            dimension_semantics=("parallel",),
            vmem_limit_bytes=_VMEM_LIMIT),
    )(x_pad, w_h, wa1, wa2)


# ------------- kernel B: fused multi-head attention, online softmax ---------------
def _attn_kernel(f1_ref, f2t_ref, mask_ref, h_ref, o_ref,
                 m_ref, l_ref, acc_ref,
                 *, nheads, f_out, alpha, apply_elu, log_softmax_classes, bf16_exp):
    k = pl.program_id(1)

    @pl.when(k == 0)
    def _init():
        m_ref[...] = jnp.full_like(m_ref, -1e30)
        l_ref[...] = jnp.zeros_like(l_ref)
        acc_ref[...] = jnp.zeros_like(acc_ref)

    f1 = f1_ref[...]                                    # (Tq, H)       f32
    f2 = f2t_ref[...]                                   # (H,  Tk)      f32, lane-dense rows
    h = h_ref[...]                                      # (Tk, H*Fout)  bf16 MXU operand
    # 0/1 mask, cast once per grid step (hoisted out of the head loop).
    mask_f32 = mask_ref[...].astype(jnp.float32)
    mask_mul = mask_f32.astype(jnp.bfloat16) if bf16_exp else mask_f32

    for hd in range(nheads):                            # static unroll over heads
        c0, c1 = hd * f_out, (hd + 1) * f_out
        # e_ij = LeakyReLU(a1.h_i + a2.h_j); maximum form (valid for 0 < alpha < 1).
        e = f1[:, hd:hd + 1] + f2[hd:hd + 1, :]         # (Tq, Tk)
        e = jnp.maximum(e, alpha * e)

        m_old = m_ref[:, hd:hd + 1]
        m_new = jnp.maximum(m_old, jnp.max(e, axis=1, keepdims=True))
        corr = jnp.exp(m_old - m_new)

        # exp(e + mask_bias) == exp(e) * mask; max over all finite e is a valid stabilizer.
        if bf16_exp:                                    # bf16 EUP path (v6e / v7x)
            pm = jnp.exp((e - m_new).astype(jnp.bfloat16)) * mask_mul
            l_upd = jnp.sum(pm.astype(jnp.float32), axis=1, keepdims=True)
        else:                                           # f32 exp path (v5e and older)
            pm32 = jnp.exp(e - m_new) * mask_mul
            l_upd = jnp.sum(pm32, axis=1, keepdims=True)
            pm = pm32.astype(jnp.bfloat16)

        pv = jnp.dot(pm, h[:, c0:c1], preferred_element_type=jnp.float32)

        # Direct scratch writes (no per-head concatenates).
        m_ref[:, hd:hd + 1] = m_new
        l_ref[:, hd:hd + 1] = corr * l_ref[:, hd:hd + 1] + l_upd
        acc_ref[:, c0:c1] = corr * acc_ref[:, c0:c1] + pv

    @pl.when(k == pl.num_programs(1) - 1)
    def _finalize():
        for hd in range(nheads):
            c0, c1 = hd * f_out, (hd + 1) * f_out
            # Exact reciprocal: a (Tq,1) divide per head per q tile -> negligible cost,
            # recovers accuracy.  max() guards fully-masked rows (l == 0 -> output 0).
            acc_ref[:, c0:c1] = acc_ref[:, c0:c1] / jnp.maximum(l_ref[:, hd:hd + 1], 1e-30)
        hp = acc_ref[...]
        if apply_elu:
            hp = jnp.where(hp > 0, hp, jnp.exp(hp) - 1.0)
        if log_softmax_classes:
            # Masked log_softmax: lanes >= nclass are zero padding, excluded here.
            lane = jax.lax.broadcasted_iota(jnp.int32, hp.shape, 1)
            valid = lane < log_softmax_classes
            zmax = jnp.max(jnp.where(valid, hp, -jnp.inf), axis=1, keepdims=True)
            z = hp - zmax
            denom = jnp.sum(jnp.where(valid, jnp.exp(z), 0.0), axis=1, keepdims=True)
            hp = z - jnp.log(denom)
        o_ref[...] = hp.astype(o_ref.dtype)


def _gat_layer(x_pad, mask_pad, weights, att_vecs, *, alpha, apply_elu,
               log_softmax_classes, out_dtype, block_q, block_k, bf16_exp):
    """One multi-head GraphAttention layer (all heads fused) on padded node arrays."""
    n_pad = x_pad.shape[0]
    nheads = len(weights)
    f_out = weights[0].shape[1]
    d_h = nheads * f_out
    dt = x_pad.dtype

    # Host-side weight folding (tiny):  f1 = (x W) a1 = x (W a1),  f2 = x (W a2).
    w_h = jnp.concatenate(list(weights), axis=1).astype(dt)                                # (Fin, H*Fout)
    wa1 = jnp.concatenate([w @ a[:f_out, :] for w, a in zip(weights, att_vecs)], 1).astype(dt)  # (Fin, H)
    wa2 = jnp.concatenate([w @ a[f_out:, :] for w, a in zip(weights, att_vecs)], 1).astype(dt)  # (Fin, H)

    h_all, f1, f2 = _project(x_pad, w_h, wa1, wa2, block_q=block_q)
    f2t = f2.T                                  # (H, Np): tiny transpose -> lane-dense rows

    grid = (n_pad // block_q, n_pad // block_k)
    kernel = functools.partial(
        _attn_kernel, nheads=nheads, f_out=f_out, alpha=alpha, apply_elu=apply_elu,
        log_softmax_classes=log_softmax_classes, bf16_exp=bf16_exp)

    return pl.pallas_call(
        kernel,
        out_shape=jax.ShapeDtypeStruct((n_pad, d_h), out_dtype),
        grid=grid,
        in_specs=[
            pl.BlockSpec((block_q, nheads), lambda q, k: (q, 0)),                          # f1
            pl.BlockSpec((nheads, block_k), lambda q, k: (0, k)),                          # f2^T
            _maybe_buffered_spec((block_q, block_k), lambda q, k: (q, k), buffers=3),      # int8 mask
            pl.BlockSpec((block_k, d_h), lambda q, k: (k, 0)),                             # h values
        ],
        out_specs=pl.BlockSpec((block_q, d_h), lambda q, k: (q, 0)),
        scratch_shapes=[
            pltpu.VMEM((block_q, nheads), jnp.float32),   # running max  m
            pltpu.VMEM((block_q, nheads), jnp.float32),   # running sum  l
            pltpu.VMEM((block_q, d_h), jnp.float32),      # running attn @ h accumulator
        ],
        compiler_params=_CompilerParams(
            dimension_semantics=("parallel", "arbitrary"),
            vmem_limit_bytes=_VMEM_LIMIT),
    )(f1, f2t, mask_pad, h_all)


def gat_forward(x, adj, params, *, alpha, max_block_q=256, max_block_k=1024):
    """GAT.forward in eval mode (dropout = identity).  Assumes every node has >= 1
    neighbour in `adj` (e.g. self-loops); see semantics note in the header."""
    assert 0.0 < alpha < 1.0
    n = x.shape[0]
    n_pad, block_q, block_k = _choose_tiling(n, max_block_q, max_block_k)
    bf16_exp = _bf16_eup_available()

    # Pad node axis; padded rows/cols are fully masked and sliced off at the end.
    x_pad = jnp.zeros((n_pad, x.shape[1]), jnp.float32).at[:n, :].set(x)
    # int8 0/1 multiplicative mask: half the HBM of a bf16 additive bias.
    mask_pad = jnp.zeros((n_pad, n_pad), jnp.int8).at[:n, :n].set((adj > 0).astype(jnp.int8))

    # x = dropout(x) -> identity (eval)
    ws = [w for (w, _) in params["attentions"]]
    avs = [a for (_, a) in params["attentions"]]
    h1 = _gat_layer(x_pad, mask_pad, ws, avs, alpha=alpha,
                    apply_elu=True, log_softmax_classes=0, out_dtype=jnp.float32,
                    block_q=block_q, block_k=block_k, bf16_exp=bf16_exp)   # (Np, nheads*nhid)
    # h1 = dropout(h1) -> identity (eval)

    # Output layer: zero-pad the class dim to 128 lanes (unmasked stores, usable MXU
    # width); log_softmax is masked to the real classes in-kernel.
    w_o, a_o = params["out_att"]
    nclass = w_o.shape[1]
    nclass_pad = _round_up(nclass, 128)
    w_o_pad = jnp.zeros((w_o.shape[0], nclass_pad), w_o.dtype).at[:, :nclass].set(w_o)
    a_o_pad = jnp.zeros((2 * nclass_pad, 1), a_o.dtype)
    a_o_pad = a_o_pad.at[:nclass, :].set(a_o[:nclass])
    a_o_pad = a_o_pad.at[nclass_pad:nclass_pad + nclass, :].set(a_o[nclass:])

    out = _gat_layer(h1, mask_pad, [w_o_pad], [a_o_pad], alpha=alpha,
                     apply_elu=True, log_softmax_classes=nclass, out_dtype=jnp.float32,
                     block_q=block_q, block_k=block_k, bf16_exp=bf16_exp)  # (Np, 128)
    return out[:n, :nclass]


# ------------------------- pure-JAX f32 reference (for checking) -------------------------
def _ref_head(x, w, a, adj, *, alpha, apply_elu):
    h = x @ w
    f_out = w.shape[1]
    f1 = h @ a[:f_out, :]
    f2 = h @ a[f_out:, :]
    e = f1 + f2.T
    e = jnp.where(e > 0, e, alpha * e)
    e = jnp.where(adj > 0, e, _MASK_BIAS)
    attn = jax.nn.softmax(e, axis=1)
    hp = attn @ h
    return jax.nn.elu(hp) if apply_elu else hp


def _ref_gat(x, adj, params, *, alpha):
    heads = [_ref_head(x, w, a, adj, alpha=alpha, apply_elu=True)
             for (w, a) in params["attentions"]]
    h = jnp.concatenate(heads, axis=1)
    w_o, a_o = params["out_att"]
    out = jax.nn.elu(_ref_head(h, w_o, a_o, adj, alpha=alpha, apply_elu=False))
    return jax.nn.log_softmax(out, axis=1)


if __name__ == "__main__":
    # Small graph; block sizes are deliberately tiny here so the (query, key) grid has
    # multiple tiles along both axes and exercises the online softmax + megacore split.
    # Production uses the larger defaults (max_block_q=256, max_block_k=1024).
    N, nfeat, nhid, nclass, nheads = 200, 32, 16, 4, 4
    alpha = 0.2

    key = jax.random.PRNGKey(0)
    k_x, k_adj, *k_params = jax.random.split(key, 2 + 2 * (nheads + 1))

    x = jax.random.normal(k_x, (N, nfeat), dtype=jnp.float32)
    adj = (jax.random.uniform(k_adj, (N, N)) > 0.9).astype(jnp.float32)
    adj = jnp.maximum(adj, jnp.eye(N, dtype=jnp.float32))   # self-loops (no isolated rows)

    def xavier(k, shape):
        bound = 1.414 * jnp.sqrt(6.0 / (shape[0] + shape[1]))
        return jax.random.uniform(k, shape, jnp.float32, -bound, bound)

    params = {"attentions": [], "out_att": None}
    for i in range(nheads):
        w = xavier(k_params[2 * i], (nfeat, nhid))
        a = xavier(k_params[2 * i + 1], (2 * nhid, 1))
        params["attentions"].append((w, a))
    w_o = xavier(k_params[2 * nheads], (nhid * nheads, nclass))
    a_o = xavier(k_params[2 * nheads + 1], (2 * nclass, 1))
    params["out_att"] = (w_o, a_o)

    out = gat_forward(x, adj, params, alpha=alpha, max_block_q=64, max_block_k=128)
    out = jax.block_until_ready(out)

    ref = _ref_gat(x, adj, params, alpha=alpha)
    assert out.shape == (N, nclass)
    # bf16 value/probability paths (intentional, for MXU/EUP throughput) dominate the
    # residual vs the pure-f32 reference; the finalize reciprocal is now exact.
    err = float(jnp.max(jnp.abs(out - ref)))
    assert err < 1e-1, f"mismatch vs reference: max abs err {err}"
    print("KERNEL_OK")
</pallas_src>

<mosaic_0001>
module attributes {stable_mosaic.version = 11 : i64} {
  func.func @_proj_kernel(%arg0: i32, %arg1: memref<64x32xf32, #tpu.memory_space<vmem>>, %arg2: memref<32x64xf32, #tpu.memory_space<vmem>>, %arg3: memref<32x4xf32, #tpu.memory_space<vmem>>, %arg4: memref<32x4xf32, #tpu.memory_space<vmem>>, %arg5: memref<64x64xbf16, #tpu.memory_space<vmem>>, %arg6: memref<64x4xf32, #tpu.memory_space<vmem>>, %arg7: memref<64x4xf32, #tpu.memory_space<vmem>>) attributes {dimension_semantics = [#tpu.dimension_semantics<parallel>], iteration_bounds = array<i64: 4>, scalar_prefetch = 0 : i64, scratch_operands = 0 : i64, tpu.core_type = #tpu.core_type<tc>, window_params = [{transform_indices = @transform_0, window_bounds = array<i64: 64, 32>}, {pipeline_mode = #tpu.pipeline_mode<synchronous>, transform_indices = @transform_1, window_bounds = array<i64: 32, 64>}, {pipeline_mode = #tpu.pipeline_mode<synchronous>, transform_indices = @transform_2, window_bounds = array<i64: 32, 4>}, {pipeline_mode = #tpu.pipeline_mode<synchronous>, transform_indices = @transform_3, window_bounds = array<i64: 32, 4>}, {transform_indices = @transform_4, window_bounds = array<i64: 64, 64>}, {transform_indices = @transform_5, window_bounds = array<i64: 64, 4>}, {transform_indices = @transform_6, window_bounds = array<i64: 64, 4>}]} {
    %c0 = arith.constant 0 : index
    %c0_0 = arith.constant 0 : index
    %0 = vector.load %arg1[%c0, %c0_0] : memref<64x32xf32, #tpu.memory_space<vmem>>, vector<64x32xf32>
    %c0_1 = arith.constant 0 : index
    %c0_2 = arith.constant 0 : index
    %1 = vector.load %arg2[%c0_1, %c0_2] : memref<32x64xf32, #tpu.memory_space<vmem>>, vector<32x64xf32>
    %cst = arith.constant dense<0.000000e+00> : vector<64x64xf32>
    %2 = tpu.matmul %0, %1, %cst {dimension_numbers = #tpu.dot_dimension_numbers<[1], [0], [0], [1], [0, 0, 1, 1], [], []>} : vector<64x32xf32>, vector<32x64xf32>, vector<64x64xf32> -> vector<64x64xf32>
    %3 = arith.truncf %2 : vector<64x64xf32> to vector<64x64xbf16>
    %c0_3 = arith.constant 0 : index
    %c0_4 = arith.constant 0 : index
    %4 = vector.load %arg5[%c0_3, %c0_4] : memref<64x64xbf16, #tpu.memory_space<vmem>>, vector<64x64xbf16>
    tpu.vector_store %arg5[%c0_3, %c0_4], %3 {strides = array<i32>} : memref<64x64xbf16, #tpu.memory_space<vmem>>, vector<64x64xbf16>,
    %c0_5 = arith.constant 0 : index
    %c0_6 = arith.constant 0 : index
    %5 = vector.load %arg3[%c0_5, %c0_6] : memref<32x4xf32, #tpu.memory_space<vmem>>, vector<32x4xf32>
    %cst_7 = arith.constant dense<0.000000e+00> : vector<64x4xf32>
    %6 = tpu.matmul %0, %5, %cst_7 {dimension_numbers = #tpu.dot_dimension_numbers<[1], [0], [0], [1], [0, 0, 1, 1], [], []>} : vector<64x32xf32>, vector<32x4xf32>, vector<64x4xf32> -> vector<64x4xf32>
    %c0_8 = arith.constant 0 : index
    %c0_9 = arith.constant 0 : index
    %7 = vector.load %arg6[%c0_8, %c0_9] : memref<64x4xf32, #tpu.memory_space<vmem>>, vector<64x4xf32>
    tpu.vector_store %arg6[%c0_8, %c0_9], %6 {strides = array<i32>} : memref<64x4xf32, #tpu.memory_space<vmem>>, vector<64x4xf32>,
    %c0_10 = arith.constant 0 : index
    %c0_11 = arith.constant 0 : index
    %8 = vector.load %arg4[%c0_10, %c0_11] : memref<32x4xf32, #tpu.memory_space<vmem>>, vector<32x4xf32>
    %cst_12 = arith.constant dense<0.000000e+00> : vector<64x4xf32>
    %9 = tpu.matmul %0, %8, %cst_12 {dimension_numbers = #tpu.dot_dimension_numbers<[1], [0], [0], [1], [0, 0, 1, 1], [], []>} : vector<64x32xf32>, vector<32x4xf32>, vector<64x4xf32> -> vector<64x4xf32>
    %c0_13 = arith.constant 0 : index
    %c0_14 = arith.constant 0 : index
    %10 = vector.load %arg7[%c0_13, %c0_14] : memref<64x4xf32, #tpu.memory_space<vmem>>, vector<64x4xf32>
    tpu.vector_store %arg7[%c0_13, %c0_14], %9 {strides = array<i32>} : memref<64x4xf32, #tpu.memory_space<vmem>>, vector<64x4xf32>,
    return
  }
  func.func @transform_0(%arg0: i32) -> (i32, i32) {
    %c0_i32 = arith.constant 0 : i32
    %c0_i32_0 = arith.constant 0 : i32
    return %arg0, %c0_i32 : i32, i32
  }
  func.func @transform_1(%arg0: i32) -> (i32, i32) {
    %c0_i32 = arith.constant 0 : i32
    %c0_i32_0 = arith.constant 0 : i32
    %c0_i32_1 = arith.constant 0 : i32
    return %c0_i32, %c0_i32_0 : i32, i32
  }
  func.func @transform_2(%arg0: i32) -> (i32, i32) {
    %c0_i32 = arith.constant 0 : i32
    %c0_i32_0 = arith.constant 0 : i32
    %c0_i32_1 = arith.constant 0 : i32
    return %c0_i32, %c0_i32_0 : i32, i32
  }
  func.func @transform_3(%arg0: i32) -> (i32, i32) {
    %c0_i32 = arith.constant 0 : i32
    %c0_i32_0 = arith.constant 0 : i32
    %c0_i32_1 = arith.constant 0 : i32
    return %c0_i32, %c0_i32_0 : i32, i32
  }
  func.func @transform_4(%arg0: i32) -> (i32, i32) {
    %c0_i32 = arith.constant 0 : i32
    %c0_i32_0 = arith.constant 0 : i32
    return %arg0, %c0_i32 : i32, i32
  }
  func.func @transform_5(%arg0: i32) -> (i32, i32) {
    %c0_i32 = arith.constant 0 : i32
    %c0_i32_0 = arith.constant 0 : i32
    return %arg0, %c0_i32 : i32, i32
  }
  func.func @transform_6(%arg0: i32) -> (i32, i32) {
    %c0_i32 = arith.constant 0 : i32
    %c0_i32_0 = arith.constant 0 : i32
    return %arg0, %c0_i32 : i32, i32
  }
}

</mosaic_0001>

<bundles_post_ra>
// kernel: tpu_custom_call.1
= control target key start
LH: loop header
LB: loop body
LE: loop exit
PB: predicated region body
PF: predicated region fallthrough
CT: control target
= control target key end

     0   :  { %s1054_s21 = smov 0   ;;  %s1190_s0 = inlined_call_operand.vmem [shape: f32[256,32], index: 0, kind: input, shape index: {}]   ;;  %s1191_s1 = inlined_call_operand.vmem [shape: f32[32,64], index: 1, kind: input, shape index: {}]   ;;  %s1192_s2 = inlined_call_operand.vmem [shape: f32[32,4], index: 2, kind: input, shape index: {}]   ;;  %s1193_s3 = inlined_call_operand.vmem [shape: f32[32,4], index: 3, kind: input, shape index: {}]   ;;  %s1194_s4 = inlined_call_operand.vmem [shape: bf16[256,64], index: 4, kind: output, shape index: {0}]   ;;  %s1195_s5 = inlined_call_operand.vmem [shape: f32[256,4], index: 5, kind: output, shape index: {1}]   ;;  %s1196_s6 = inlined_call_operand.vmem [shape: f32[256,4], index: 6, kind: output, shape index: {2}]  }
   0x1 LB: > { %s824_s22 = sadd.s32 4294967295, %s1017_s21   ;;  %p828_p0 = scmp.ge.s32.totalorder %s1017_s21, 1  ;;  %s1017_s21 = sphi %s1054_s21, %s17_s21  }
   0x2   : > { %p218_p1 = scmp.lt.s32.totalorder %s1017_s21, 5 }
   0x4   : > { %p219_p2 = pnand %p828_p0, %p218_p1 }
   0x5   : > { %v290_v0 = vld [vmem:[%s1191_s1] sm:$0xff] (!%p219_p2)  ;;  %v291_v1 = vld [vmem:[%s1191_s1 + $0x8] sm:$0xff] (!%p219_p2)  ;;  %v292_v2 = vld [vmem:[%s1191_s1 + $0x10] sm:$0xff] (!%p219_p2)  ;;  %s829_s29 = sshll.u32 (!%p219_p2), %s824_s22, 3  ;;  %vm294_vm0 = vcmask (!%p219_p2), 261120   ;;  %vm456_vm1 = vcmask (!%p219_p2), 519168  }
   0x6   : > { %222 = sbr.rel (%p219_p2) target bundleno = 253 (0xfd), region = 36  ;;  %v975_v3 = vpack.c.bf16 (!%p219_p2), %v291_v1, %v290_v0  ;;  %v293_v4 = vld [vmem:[%s1191_s1 + $0x18] sm:$0xff] (!%p219_p2)  ;;  %p259_p3 = scmp.lt.s32.totalorder (!%p219_p2), %s829_s29, 31  ;;  %v465_v6 = vld [vmem:[%s1192_s2] sm:$0xff] (!%p219_p2)  ;;  %v466_v7 = vld [vmem:[%s1192_s2 + $0x8] sm:$0xff] (!%p219_p2)  ;;  %vm574_vm2 = vcmask (!%p219_p2), 31744  }
   0x7   : > { %v979_v5 = vpack.c.bf16 (!%p219_p2), %v293_v4, %v292_v2  ;;  %v583_v8 = vld [vmem:[%s1193_s3] sm:$0xff] (!%p219_p2)  ;;  %v584_v9 = vld [vmem:[%s1193_s3 + $0x8] sm:$0xff] (!%p219_p2)  ;;  %v983_v10 = vpack.c.bf16 (!%p219_p2), %v466_v7, %v465_v6  ;;  %v467_v12 = vld [vmem:[%s1192_s2 + $0x10] sm:$0xff] (!%p219_p2) }
   0x8   : > { %976 = vmatprep.subr.bf16.mxu0 (!%p219_p2), %v975_v3  ;;  %999 = vmatprep.subr.bf16.mxu1 (!%p219_p2), %v975_v3  ;;  %v991_v11 = vpack.c.bf16 (!%p219_p2), %v584_v9, %v583_v8  ;;  %v468_v13 = vld [vmem:[%s1192_s2 + $0x18] sm:$0xff] (!%p219_p2)  ;;  %v585_v14 = vld [vmem:[%s1193_s3 + $0x10] sm:$0xff] (!%p219_p2) }
   0x9   : > { %978 = vmatpush3.bf16.msra.mxu0 (!%p219_p2), %v975_v3  ;;  %1001 = vmatpush3.bf16.msra.mxu1 (!%p219_p2), %v975_v3  ;;  %v586_v17 = vld [vmem:[%s1193_s3 + $0x18] sm:$0xff] (!%p219_p2)  ;;  %v987_v22 = vpack.c.bf16 (!%p219_p2), %v468_v13, %v467_v12 }
   0xa   : > { %980 = vmatprep.subr.bf16.mxu0 (!%p219_p2), %v979_v5  ;;  %1000 = vmatprep.subr.bf16.mxu1 (!%p219_p2), %v979_v5  ;;  %v995_v23 = vpack.c.bf16 (!%p219_p2), %v586_v17, %v585_v14 }
   0xd   : > { %s1198_s29 = smov (!%p259_p3, %s829_s29), 31  ;;  %982 = vmatpush3.bf16.msra.mxu0 %v979_v5  ;;  %1002 = vmatpush3.bf16.msra.mxu1 %v979_v5 }
   0xe   : > { %s1089_s16 = sshll.u32 %s1198_s29, 3  ;;  %984 = vmatprep.subr.bf16.mxu1 %v983_v10  ;;  %992 = vmatprep.subr.bf16.mxu0 %v991_v11  ;;  %s832_s30 = sshll.u32 %s1198_s29, 2 }
   0xf   : > { %s262_s19 = scalar_lea.vmem %s1190_s0, %s1089_s16  ;;  %s268_s9 = scalar_lea.vmem %s1194_s4, %s832_s30 }
  0x10   : > { %v282_v15 = vld [vmem:[%s262_s19] sm:$0xff]  ;;  %v283_v18 = vld [vmem:[%s262_s19 + $0x8] sm:$0xff]  ;;  %v284_v20 = vld [vmem:[%s262_s19 + $0x10] sm:$0xff]  ;;  %s1143_s11 = scalar_lea.vmem %s1195_s5, %s1089_s16  ;;  %s1149_s14 = scalar_lea.vmem %s1196_s6, %s1089_s16 }
  0x11   : > { %v286_v16 = vld [vmem:[%s262_s19 + $0x20] sm:$0xff]  ;;  %v287_v19 = vld [vmem:[%s262_s19 + $0x28] sm:$0xff]  ;;  %923 = vmatprep.mubr.msk.f32.mxu0 %vm294_vm0, %v282_v15  ;;  %v288_v21 = vld [vmem:[%s262_s19 + $0x30] sm:$0xff] }
  0x12   : > { %929 = vmatprep.mubr.msk.f32.mxu1 %vm294_vm0, %v286_v16  ;;  %924 = vmatmul.mubr.msk.f32.vlgmr.msra.gmra.mrb[0].mxu0 %vm294_vm0, %v283_v18  ;;  %v285_v24 = vld [vmem:[%s262_s19 + $0x18] sm:$0xff] }
  0x13   : > { %930 = vmatmul.mubr.msk.f32.vlgmr.msra.gmra.mrb[0].mxu1 %vm294_vm0, %v287_v19  ;;  %994 = vmatpush3.bf16.msra.mxu0 %v991_v11  ;;  %v289_v25 = vld [vmem:[%s262_s19 + $0x38] sm:$0xff] }
  0x14   : > { %986 = vmatpush3.bf16.msra.mxu1 %v983_v10  ;;  %926 = vmatprep.mubr.msk.f32.mxu0 %vm294_vm0, %v284_v20 }
  0x15   : > { %932 = vmatprep.mubr.msk.f32.mxu1 %vm294_vm0, %v288_v21  ;;  %988 = vmatprep.subr.bf16.mxu1 %v987_v22 }
  0x16   : > { %996 = vmatprep.subr.bf16.mxu0 %v995_v23  ;;  %927 = vmatmul.mubr.msk.f32.gmra.mrb[2].mxu0 %vm294_vm0, %v285_v24 }
  0x17   : > { %933 = vmatmul.mubr.msk.f32.gmra.mrb[2].mxu1 %vm294_vm0, %v289_v25  ;;  %998 = vmatpush3.bf16.msra.mxu0 %v995_v23 }
  0x18   : > { %990 = vmatpush3.bf16.msra.mxu1 %v987_v22  ;;  %943 = vmatprep.mubr.msk.f32.mxu1 %vm294_vm0, %v282_v15 }
  0x19   : > { %963 = vmatprep.mubr.msk.f32.mxu0 %vm294_vm0, %v282_v15 }
  0x1a   : > { %964 = vmatmul.mubr.msk.f32.vlgmr.msra.gmra.mrb[4].mxu0 %vm294_vm0, %v283_v18 }
  0x1b   : > { %944 = vmatmul.mubr.msk.f32.vlgmr.msra.gmra.mrb[4].mxu1 %vm294_vm0, %v283_v18  ;;  %966 = vmatprep.mubr.msk.f32.mxu0 %vm294_vm0, %v284_v20 }
  0x1c   : > { %946 = vmatprep.mubr.msk.f32.mxu1 %vm294_vm0, %v284_v20 }
  0x1e   : > { %967 = vmatmul.mubr.msk.f32.gmra.mrb[6].mxu0 %vm294_vm0, %v285_v24 }
  0x1f   : > { %947 = vmatmul.mubr.msk.f32.gmra.mrb[6].mxu1 %vm294_vm0, %v285_v24  ;;  %969 = vmatprep.mubr.msk.f32.mxu0 %vm294_vm0, %v286_v16 }
  0x20   : > { %949 = vmatprep.mubr.msk.f32.mxu1 %vm294_vm0, %v286_v16 }
  0x22   : > { %970 = vmatmul.mubr.msk.f32.gmra.mrb[8].mxu0 %vm294_vm0, %v287_v19 }
  0x23   : > { %950 = vmatmul.mubr.msk.f32.gmra.mrb[8].mxu1 %vm294_vm0, %v287_v19  ;;  %972 = vmatprep.mubr.msk.f32.mxu0 %vm294_vm0, %v288_v21 }
  0x24   : > { %952 = vmatprep.mubr.msk.f32.mxu1 %vm294_vm0, %v288_v21 }
  0x26   : > { %973 = vmatmul.mubr.msk.f32.gmra.mrb[10].mxu0 %vm294_vm0, %v289_v25 }
  0x27   : > { %953 = vmatmul.mubr.msk.f32.gmra.mrb[10].mxu1 %vm294_vm0, %v289_v25 }
  0xe5   : > { %v925_v26 = vpop.f32.mrb[0].mxu0 }
  0xe6   : > { %v931_v27 = vpop.f32.mrb[0].mxu1  ;;  %v872_v28 = vpack.c.bf16 %v925_v26, %v925_v26  ;;  %v385_v30 = vpop.f32.mrb[1].mxu0 }
  0xe7   : > { %v876_v29 = vpack.c.bf16 %v931_v27, %v931_v27  ;;  %v405_v31 = vpop.f32.mrb[1].mxu1  ;;  %v871_v32 = vpack.c.bf16 %v385_v30, %v385_v30 }
  0xe8   : > { %v875_v33 = vpack.c.bf16 %v405_v31, %v405_v31  ;;  %458 = vst.msk [vmem:[%s268_s9 + $0x4] sm:$0xf] %vm456_vm1, %v872_v28 }
  0xe9   : > { %462 = vst.msk [vmem:[%s268_s9 + $0x14] sm:$0xf] %vm456_vm1, %v876_v29  ;;  %457 = vst.msk [vmem:[%s268_s9] sm:$0xf] %vm456_vm1, %v871_v32  ;;  %v928_v34 = vpop.f32.mrb[2].mxu0 }
  0xea   : > { %461 = vst.msk [vmem:[%s268_s9 + $0x10] sm:$0xf] %vm456_vm1, %v875_v33  ;;  %v934_v35 = vpop.f32.mrb[2].mxu1  ;;  %v874_v36 = vpack.c.bf16 %v928_v34, %v928_v34  ;;  %v395_v38 = vpop.f32.mrb[3].mxu0 }
  0xeb   : > { %v878_v37 = vpack.c.bf16 %v934_v35, %v934_v35  ;;  %v415_v39 = vpop.f32.mrb[3].mxu1  ;;  %v873_v40 = vpack.c.bf16 %v395_v38, %v395_v38 }
  0xec   : > { %v877_v41 = vpack.c.bf16 %v415_v39, %v415_v39  ;;  %460 = vst.msk [vmem:[%s268_s9 + $0xc] sm:$0xf] %vm456_vm1, %v874_v36 }
  0xed   : > { %464 = vst.msk [vmem:[%s268_s9 + $0x1c] sm:$0xf] %vm456_vm1, %v878_v37  ;;  %459 = vst.msk [vmem:[%s268_s9 + $0x8] sm:$0xf] %vm456_vm1, %v873_v40  ;;  %v965_v43 = vpop.f32.mrb[4].mxu0 }
  0xee   : > { %463 = vst.msk [vmem:[%s268_s9 + $0x18] sm:$0xf] %vm456_vm1, %v877_v41  ;;  %v945_v42 = vpop.f32.mrb[4].mxu1  ;;  %v653_v45 = vpop.f32.mrb[5].mxu0 }
  0xef   : > { %576 = vst.msk [vmem:[%s1143_s11 + $0x8] sm:$0xff] %vm574_vm2, %v945_v42  ;;  %693 = vst.msk [vmem:[%s1149_s14 + $0x8] sm:$0xff] %vm574_vm2, %v965_v43  ;;  %v535_v44 = vpop.f32.mrb[5].mxu1 }
  0xf0   : > { %575 = vst.msk [vmem:[%s1143_s11] sm:$0xff] %vm574_vm2, %v535_v44  ;;  %692 = vst.msk [vmem:[%s1149_s14] sm:$0xff] %vm574_vm2, %v653_v45 }
  0xf1   : > { %v968_v47 = vpop.f32.mrb[6].mxu0 }
  0xf2   : > { %v948_v46 = vpop.f32.mrb[6].mxu1  ;;  %695 = vst.msk [vmem:[%s1149_s14 + $0x18] sm:$0xff] %vm574_vm2, %v968_v47  ;;  %v663_v49 = vpop.f32.mrb[7].mxu0 }
  0xf3   : > { %578 = vst.msk [vmem:[%s1143_s11 + $0x18] sm:$0xff] %vm574_vm2, %v948_v46  ;;  %v545_v48 = vpop.f32.mrb[7].mxu1  ;;  %694 = vst.msk [vmem:[%s1149_s14 + $0x10] sm:$0xff] %vm574_vm2, %v663_v49 }
  0xf4   : > { %577 = vst.msk [vmem:[%s1143_s11 + $0x10] sm:$0xff] %vm574_vm2, %v545_v48 }
  0xf5   : > { %v971_v51 = vpop.f32.mrb[8].mxu0 }
  0xf6   : > { %v951_v50 = vpop.f32.mrb[8].mxu1  ;;  %697 = vst.msk [vmem:[%s1149_s14 + $0x28] sm:$0xff] %vm574_vm2, %v971_v51  ;;  %v673_v53 = vpop.f32.mrb[9].mxu0 }
  0xf7   : > { %580 = vst.msk [vmem:[%s1143_s11 + $0x28] sm:$0xff] %vm574_vm2, %v951_v50  ;;  %v555_v52 = vpop.f32.mrb[9].mxu1  ;;  %696 = vst.msk [vmem:[%s1149_s14 + $0x20] sm:$0xff] %vm574_vm2, %v673_v53 }
  0xf8   : > { %579 = vst.msk [vmem:[%s1143_s11 + $0x20] sm:$0xff] %vm574_vm2, %v555_v52 }
  0xf9   : > { %v974_v55 = vpop.f32.mrb[10].mxu0 }
  0xfa   : > { %v954_v54 = vpop.f32.mrb[10].mxu1  ;;  %699 = vst.msk [vmem:[%s1149_s14 + $0x38] sm:$0xff] %vm574_vm2, %v974_v55  ;;  %v683_v57 = vpop.f32.mrb[11].mxu0 }
  0xfb   : > { %582 = vst.msk [vmem:[%s1143_s11 + $0x38] sm:$0xff] %vm574_vm2, %v954_v54  ;;  %v565_v56 = vpop.f32.mrb[11].mxu1  ;;  %698 = vst.msk [vmem:[%s1149_s14 + $0x30] sm:$0xff] %vm574_vm2, %v683_v57 }
  0xfc   : > { %581 = vst.msk [vmem:[%s1143_s11 + $0x30] sm:$0xff] %vm574_vm2, %v565_v56 }
  0xfd PF: > { %s17_s21 = sadd.s32 1, %s1017_s21  }
  0xfe   : > { %p14_p4 = scmp.ge.s32.totalorder %s17_s21, 6  }
 0x100   :  { %16 = sbr.rel (!%p14_p4) target bundleno = 1 (0x1), region = 90 }

</bundles_post_ra>
